<compile_context>
chip_gen: v6e
topology: v6e:2x2x1
jax: 0.10.0
libtpu: 0.0.40
codegen_flags: <defaults>
</compile_context>

<pallas_src>
import functools

import jax
import jax.numpy as jnp
from jax.experimental import pallas as pl
from jax.experimental.pallas import tpu as pltpu


def _round_up(x, m):
    return ((x + m - 1) // m) * m


def _pick_batch_tile(batch, batch_tile):
    """Batch tile: block==array for tiny batches, >=2 tiles otherwise (v7x megacore)."""
    if batch <= 8:
        return batch                                   # block == full array dim (legal)
    if batch < 2 * batch_tile:
        return min(batch_tile, _round_up(pl.cdiv(batch, 2), 8))
    return batch_tile


def _pick_vmem_limit(est_bytes):
    """2x the estimated working set, >=32 MiB, capped at 3/4 of physical VMEM."""
    cap = 128 * 1024 * 1024
    try:
        info = pltpu.get_tpu_info()
        cap = int(getattr(info, "vmem_capacity_bytes", cap))
    except Exception:
        pass
    limit = max(32 * 1024 * 1024, 2 * int(est_bytes))
    return int(min(limit, cap * 3 // 4))


def _linear_avgpool_kernel(cls_ref, patch_ref, w_cls_ref, w_avg_ref, b_ref,
                           o_ref, psum_ref, *, inv_t, valid_last):
    # Grid = (batch tiles ["parallel"], token tiles ["arbitrary" reduction, last]).
    # cls_ref:   (tb, Dc)     source dtype, concatenated class tokens
    # patch_ref: (tb, tt, D)  source dtype, streamed patch-token tile
    # w_cls_ref: (Dc, Cp) bf16 resident   w_avg_ref: (D, Cp) bf16 resident
    # b_ref:     (1, Cp) f32 resident
    # o_ref:     (tb, Cp) f32, resident across the token axis (accumulated into)
    # psum_ref:  (tb, D)  f32 scratch accumulator for the patch-token sum
    k = pl.program_id(1)
    nt = pl.num_programs(1)

    @pl.when(k == 0)
    def _init():
        psum_ref[...] = jnp.zeros_like(psum_ref)
        # Hoisted: class-token matmul + bias, hidden under later patch-tile DMAs.
        o_ref[...] = jnp.dot(cls_ref[...].astype(jnp.bfloat16), w_cls_ref[...],
                             preferred_element_type=jnp.float32) + b_ref[...]

    # Stream the patch tokens: accumulate their sum in f32 (in-kernel cast, tile-wise).
    x = patch_ref[...].astype(jnp.float32)
    if valid_last == patch_ref.shape[1]:
        # tt divides T: every tile is full.
        psum_ref[...] += jnp.sum(x, axis=1)
    else:
        # Ragged last token tile: only the first `valid_last` rows are real tokens.
        @pl.when(k < nt - 1)
        def _full():
            psum_ref[...] += jnp.sum(x, axis=1)

        @pl.when(k == nt - 1)
        def _tail():
            psum_ref[...] += jnp.sum(x[:, :valid_last, :], axis=1)

    @pl.when(k == nt - 1)
    def _finalize():
        mean_bf16 = (psum_ref[...] * inv_t).astype(jnp.bfloat16)
        o_ref[...] += jnp.dot(mean_bf16, w_avg_ref[...],
                              preferred_element_type=jnp.float32)


def _linear_kernel(cls_ref, w_ref, b_ref, o_ref):
    # Grid = (batch tiles ["parallel"],)
    o_ref[...] = jnp.dot(cls_ref[...].astype(jnp.bfloat16), w_ref[...],
                         preferred_element_type=jnp.float32) + b_ref[...]


class LinearClassifierPallas:
    """Pallas/TPU equivalent of LinearClassifier (normalize=None)."""

    def __init__(self, out_dim, use_n_blocks, use_avgpool, output_dim=1000,
                 seed=0, batch_tile=256, token_tile=32):
        self.out_dim = out_dim
        self.use_n_blocks = use_n_blocks
        self.use_avgpool = use_avgpool
        self.num_classes = output_dim
        self.batch_tile = batch_tile      # v6e: 256 fills the MXU; v5e also fine (2 passes)
        self.token_tile = token_tile

        key = jax.random.PRNGKey(seed)
        # nn.Linear(out_dim, num_classes): weight (C, out_dim) ~ N(0, 0.01), bias = 0.
        w = jax.random.normal(key, (output_dim, out_dim), jnp.float32) * 0.01
        self.weight_t_f32 = jnp.transpose(w)                        # (out_dim, C) f32 master
        self.bias_f32 = jnp.zeros((1, output_dim), jnp.float32)

        # Kernel-side copies (built ONCE): bf16 transposed weight, class dim padded to 128.
        self.c_padded = _round_up(output_dim, 128)
        pad_c = self.c_padded - output_dim
        self.weight_t_bf16 = jnp.pad(self.weight_t_f32.astype(jnp.bfloat16),
                                     ((0, 0), (0, pad_c)))          # (out_dim, Cp)
        self.bias_padded = jnp.pad(self.bias_f32, ((0, 0), (0, pad_c)))  # (1, Cp)

        if use_avgpool:
            assert out_dim % (use_n_blocks + 1) == 0, "out_dim must be (n_blocks+1)*embed_dim"
            self.d_embed = out_dim // (use_n_blocks + 1)
            self.dc = out_dim - self.d_embed
            # Static weight slices, precomputed (no per-call HBM re-materialization).
            self.w_cls_bf16 = self.weight_t_bf16[:self.dc, :]       # (Dc, Cp)
            self.w_avg_bf16 = self.weight_t_bf16[self.dc:, :]       # (D,  Cp)
        else:
            self.d_embed = None
            self.dc = out_dim

    def __call__(self, x_tokens_list):
        # x_tokens_list: list of (patch_tokens [B,T,D], class_token [B,D]) per block.
        intermediate = x_tokens_list[-self.use_n_blocks:]
        # Class tokens stay in their source dtype; the kernel casts per-tile.
        cls_feat = jnp.concatenate([ct for _, ct in intermediate], axis=-1)   # (B, Dc)
        B, Dc = cls_feat.shape
        Cp = self.c_padded
        assert Dc == self.dc

        tb = _pick_batch_tile(B, self.batch_tile)
        nb = pl.cdiv(B, tb)

        if self.use_avgpool:
            patch = intermediate[-1][0]                     # (B, T, D) source dtype, no copy
            T, D = patch.shape[1], patch.shape[2]
            assert D == self.d_embed
            tt = T if T <= self.token_tile else self.token_tile
            nt = pl.cdiv(T, tt)
            valid_last = T - (nt - 1) * tt                  # tokens valid in the last tile

            kernel = functools.partial(_linear_avgpool_kernel,
                                       inv_t=1.0 / T, valid_last=valid_last)

            est_bytes = (self.w_cls_bf16.size * 2 + self.w_avg_bf16.size * 2
                         + self.bias_padded.size * 4
                         + 2 * (tb * Dc * cls_feat.dtype.itemsize
                                + tb * tt * D * patch.dtype.itemsize
                                + tb * Cp * 4)
                         + tb * D * 4)

            out = pl.pallas_call(
                kernel,
                out_shape=jax.ShapeDtypeStruct((B, Cp), jnp.float32),
                grid_spec=pltpu.PrefetchScalarGridSpec(
                    num_scalar_prefetch=0,
                    grid=(nb, nt),
                    in_specs=[
                        pl.BlockSpec((tb, Dc), lambda i, k: (i, 0)),
                        pl.BlockSpec((tb, tt, D), lambda i, k: (i, k, 0)),
                        pl.BlockSpec((Dc, Cp), lambda i, k: (0, 0)),   # resident
                        pl.BlockSpec((D, Cp), lambda i, k: (0, 0)),    # resident
                        pl.BlockSpec((1, Cp), lambda i, k: (0, 0)),    # resident
                    ],
                    out_specs=pl.BlockSpec((tb, Cp), lambda i, k: (i, 0)),
                    scratch_shapes=[pltpu.VMEM((tb, D), jnp.float32)],
                ),
                compiler_params=pltpu.CompilerParams(
                    dimension_semantics=("parallel", "arbitrary"),
                    vmem_limit_bytes=_pick_vmem_limit(est_bytes),
                ),
            )(cls_feat, patch, self.w_cls_bf16, self.w_avg_bf16, self.bias_padded)
        else:
            est_bytes = (self.weight_t_bf16.size * 2 + self.bias_padded.size * 4
                         + 2 * (tb * Dc * cls_feat.dtype.itemsize + tb * Cp * 4))
            out = pl.pallas_call(
                _linear_kernel,
                out_shape=jax.ShapeDtypeStruct((B, Cp), jnp.float32),
                grid_spec=pltpu.PrefetchScalarGridSpec(
                    num_scalar_prefetch=0,
                    grid=(nb,),
                    in_specs=[
                        pl.BlockSpec((tb, Dc), lambda i: (i, 0)),
                        pl.BlockSpec((Dc, Cp), lambda i: (0, 0)),      # resident
                        pl.BlockSpec((1, Cp), lambda i: (0, 0)),       # resident
                    ],
                    out_specs=pl.BlockSpec((tb, Cp), lambda i: (i, 0)),
                ),
                compiler_params=pltpu.CompilerParams(
                    dimension_semantics=("parallel",),
                    vmem_limit_bytes=_pick_vmem_limit(est_bytes),
                ),
            )(cls_feat, self.weight_t_bf16, self.bias_padded)

        # Slice away the class padding (batch dim is already exact: ragged writes masked).
        return out[:, :self.num_classes]


def _reference_f32(x_tokens_list, use_n_blocks, use_avgpool, weight_t, bias):
    """Exact PyTorch semantics (pure f32)."""
    intermediate = x_tokens_list[-use_n_blocks:]
    feat = jnp.concatenate([ct for _, ct in intermediate], axis=-1)
    if use_avgpool:
        feat = jnp.concatenate([feat, jnp.mean(intermediate[-1][0], axis=1)], axis=-1)
    return jnp.dot(feat.astype(jnp.float32), weight_t,
                   precision=jax.lax.Precision.HIGHEST) + bias


def _reference_bf16_matched(x_tokens_list, use_n_blocks, use_avgpool,
                            weight_t_bf16, bias, num_classes):
    """Reference that mirrors the kernel's bf16-input / f32-accumulate math."""
    intermediate = x_tokens_list[-use_n_blocks:]
    cls = jnp.concatenate([ct for _, ct in intermediate], axis=-1).astype(jnp.float32)
    cls_b = cls.astype(jnp.bfloat16).astype(jnp.float32)
    w = weight_t_bf16[:, :num_classes].astype(jnp.float32)
    dc = cls.shape[-1]
    out = jnp.dot(cls_b, w[:dc], precision=jax.lax.Precision.HIGHEST) + bias
    if use_avgpool:
        mean = jnp.mean(intermediate[-1][0].astype(jnp.float32), axis=1)
        mean_b = mean.astype(jnp.bfloat16).astype(jnp.float32)
        out = out + jnp.dot(mean_b, w[dc:], precision=jax.lax.Precision.HIGHEST)
    return out


if __name__ == "__main__":
    # Small synthetic shapes: 3 blocks, use last 2.  T=12 with token_tile=8 exercises the
    # ragged last token tile; the B=10 call exercises ragged batch tiles (tb=8, 2 tiles).
    B, T, D = 2, 12, 32
    n_blocks_total, use_n_blocks = 3, 2
    num_classes = 16

    key = jax.random.PRNGKey(0)

    def make_tokens(key, b, t, d, n):
        lst = []
        for _ in range(n):
            key, k1, k2 = jax.random.split(key, 3)
            lst.append((jax.random.normal(k1, (b, t, d), jnp.float32),
                        jax.random.normal(k2, (b, d), jnp.float32)))
        return key, lst

    key, toks = make_tokens(key, B, T, D, n_blocks_total)

    # --- avgpool path ---
    out_dim_ap = use_n_blocks * D + D
    model_ap = LinearClassifierPallas(out_dim_ap, use_n_blocks, True,
                                      output_dim=num_classes, seed=0, token_tile=8)
    out = jax.block_until_ready(model_ap(toks))
    assert out.shape == (B, num_classes)
    ref_m = _reference_bf16_matched(toks, use_n_blocks, True,
                                    model_ap.weight_t_bf16, model_ap.bias_f32, num_classes)
    assert jnp.allclose(out, ref_m, atol=1e-3, rtol=1e-3), "avgpool: mismatch vs matched ref"
    ref_f = _reference_f32(toks, use_n_blocks, True,
                           model_ap.weight_t_f32, model_ap.bias_f32)
    assert jnp.allclose(out, ref_f, atol=5e-2, rtol=5e-2), "avgpool: mismatch vs f32 ref"

    # --- no-avgpool path ---
    out_dim_na = use_n_blocks * D
    model_na = LinearClassifierPallas(out_dim_na, use_n_blocks, False,
                                      output_dim=num_classes, seed=1)
    out2 = jax.block_until_ready(model_na(toks))
    assert out2.shape == (B, num_classes)
    ref2_m = _reference_bf16_matched(toks, use_n_blocks, False,
                                     model_na.weight_t_bf16, model_na.bias_f32, num_classes)
    assert jnp.allclose(out2, ref2_m, atol=1e-3, rtol=1e-3), "linear: mismatch vs matched ref"

    # --- ragged batch tiles (B=10 -> tb=8, 2 batch tiles, last has 2 valid rows) ---
    key, toks10 = make_tokens(key, 10, T, D, n_blocks_total)
    out3 = jax.block_until_ready(model_ap(toks10))
    assert out3.shape == (10, num_classes)
    ref3_m = _reference_bf16_matched(toks10, use_n_blocks, True,
                                     model_ap.weight_t_bf16, model_ap.bias_f32, num_classes)
    assert jnp.allclose(out3, ref3_m, atol=1e-3, rtol=1e-3), "ragged batch: mismatch"

    print("KERNEL_OK")
</pallas_src>

<mosaic_0001>
module attributes {stable_mosaic.version = 11 : i64} {
  func.func @_linear_avgpool_kernel(%arg0: i32, %arg1: i32, %arg2: memref<2x64xf32, #tpu.memory_space<vmem>>, %arg3: memref<2x8x32xf32, #tpu.memory_space<vmem>>, %arg4: memref<64x128xbf16, #tpu.memory_space<vmem>>, %arg5: memref<32x128xbf16, #tpu.memory_space<vmem>>, %arg6: memref<1x128xf32, #tpu.memory_space<vmem>>, %arg7: memref<2x128xf32, #tpu.memory_space<vmem>>, %arg8: memref<2x32xf32, #tpu.memory_space<vmem>>) attributes {dimension_semantics = [#tpu.dimension_semantics<parallel>, #tpu.dimension_semantics<arbitrary>], iteration_bounds = array<i64: 1, 2>, scalar_prefetch = 0 : i64, scratch_operands = 1 : i64, tpu.core_type = #tpu.core_type<tc>, window_params = [{transform_indices = @transform_0, window_bounds = array<i64: 2, 64>}, {transform_indices = @transform_1, window_bounds = array<i64: 2, 8, 32>}, {pipeline_mode = #tpu.pipeline_mode<synchronous>, transform_indices = @transform_2, window_bounds = array<i64: 64, 128>}, {pipeline_mode = #tpu.pipeline_mode<synchronous>, transform_indices = @transform_3, window_bounds = array<i64: 32, 128>}, {pipeline_mode = #tpu.pipeline_mode<synchronous>, transform_indices = @transform_4, window_bounds = array<i64: 1, 128>}, {transform_indices = @transform_5, window_bounds = array<i64: 2, 128>}]} {
    %c0_i32 = arith.constant 0 : i32
    %0 = arith.cmpi eq, %arg1, %c0_i32 : i32
    %1 = arith.extui %0 : i1 to i32
    %c0_i32_0 = arith.constant 0 : i32
    %2 = arith.cmpi ne, %1, %c0_i32_0 : i32
    scf.if %2 {
      %cst = arith.constant 0.000000e+00 : f32
      %13 = vector.broadcast %cst : f32 to vector<2x32xf32>
      %c0_8 = arith.constant 0 : index
      %c0_9 = arith.constant 0 : index
      %14 = vector.load %arg8[%c0_8, %c0_9] : memref<2x32xf32, #tpu.memory_space<vmem>>, vector<2x32xf32>
      tpu.vector_store %arg8[%c0_8, %c0_9], %13 {strides = array<i32>} : memref<2x32xf32, #tpu.memory_space<vmem>>, vector<2x32xf32>,
      %c0_10 = arith.constant 0 : index
      %c0_11 = arith.constant 0 : index
      %15 = vector.load %arg2[%c0_10, %c0_11] : memref<2x64xf32, #tpu.memory_space<vmem>>, vector<2x64xf32>
      %16 = arith.truncf %15 : vector<2x64xf32> to vector<2x64xbf16>
      %c0_12 = arith.constant 0 : index
      %c0_13 = arith.constant 0 : index
      %17 = vector.load %arg4[%c0_12, %c0_13] : memref<64x128xbf16, #tpu.memory_space<vmem>>, vector<64x128xbf16>
      %cst_14 = arith.constant dense<0.000000e+00> : vector<2x128xf32>
      %18 = tpu.matmul %16, %17, %cst_14 {dimension_numbers = #tpu.dot_dimension_numbers<[1], [0], [0], [1], [0, 0, 1, 1], [], []>} : vector<2x64xbf16>, vector<64x128xbf16>, vector<2x128xf32> -> vector<2x128xf32>
      %c0_15 = arith.constant 0 : index
      %c0_16 = arith.constant 0 : index
      %19 = vector.load %arg6[%c0_15, %c0_16] : memref<1x128xf32, #tpu.memory_space<vmem>>, vector<1x128xf32>
      %20 = vector.broadcast %19 : vector<1x128xf32> to vector<2x128xf32>
      %21 = arith.addf %18, %20 : vector<2x128xf32>
      %c0_17 = arith.constant 0 : index
      %c0_18 = arith.constant 0 : index
      %22 = vector.load %arg7[%c0_17, %c0_18] : memref<2x128xf32, #tpu.memory_space<vmem>>, vector<2x128xf32>
      tpu.vector_store %arg7[%c0_17, %c0_18], %21 {strides = array<i32>} : memref<2x128xf32, #tpu.memory_space<vmem>>, vector<2x128xf32>,
    } else {
    }
    %c0 = arith.constant 0 : index
    %c0_1 = arith.constant 0 : index
    %c0_2 = arith.constant 0 : index
    %3 = vector.load %arg3[%c0, %c0_1, %c0_2] : memref<2x8x32xf32, #tpu.memory_space<vmem>>, vector<2x8x32xf32>
    %c1_i32 = arith.constant 1 : i32
    %4 = arith.cmpi slt, %arg1, %c1_i32 : i32
    %5 = arith.extui %4 : i1 to i32
    %c0_i32_3 = arith.constant 0 : i32
    %6 = arith.cmpi ne, %5, %c0_i32_3 : i32
    scf.if %6 {
      %c0_8 = arith.constant 0 : index
      %c0_9 = arith.constant 0 : index
      %13 = vector.load %arg8[%c0_8, %c0_9] : memref<2x32xf32, #tpu.memory_space<vmem>>, vector<2x32xf32>
      %cst = arith.constant dense<0.000000e+00> : vector<2x32xf32>
      %14 = vector.multi_reduction <add>, %3, %cst [1] : vector<2x8x32xf32> to vector<2x32xf32>
      %15 = arith.addf %13, %14 : vector<2x32xf32>
      %c0_10 = arith.constant 0 : index
      %c0_11 = arith.constant 0 : index
      %16 = vector.load %arg8[%c0_10, %c0_11] : memref<2x32xf32, #tpu.memory_space<vmem>>, vector<2x32xf32>
      tpu.vector_store %arg8[%c0_10, %c0_11], %15 {strides = array<i32>} : memref<2x32xf32, #tpu.memory_space<vmem>>, vector<2x32xf32>,
    } else {
    }
    %c1_i32_4 = arith.constant 1 : i32
    %7 = arith.cmpi eq, %arg1, %c1_i32_4 : i32
    %8 = arith.extui %7 : i1 to i32
    %c0_i32_5 = arith.constant 0 : i32
    %9 = arith.cmpi ne, %8, %c0_i32_5 : i32
    scf.if %9 {
      %c0_8 = arith.constant 0 : index
      %c0_9 = arith.constant 0 : index
      %13 = vector.load %arg8[%c0_8, %c0_9] : memref<2x32xf32, #tpu.memory_space<vmem>>, vector<2x32xf32>
      %14 = vector.extract_strided_slice %3 {offsets = [0, 0, 0], sizes = [2, 4, 32], strides = [1, 1, 1]} : vector<2x8x32xf32> to vector<2x4x32xf32>
      %cst = arith.constant dense<0.000000e+00> : vector<2x32xf32>
      %15 = vector.multi_reduction <add>, %14, %cst [1] : vector<2x4x32xf32> to vector<2x32xf32>
      %16 = arith.addf %13, %15 : vector<2x32xf32>
      %c0_10 = arith.constant 0 : index
      %c0_11 = arith.constant 0 : index
      %17 = vector.load %arg8[%c0_10, %c0_11] : memref<2x32xf32, #tpu.memory_space<vmem>>, vector<2x32xf32>
      tpu.vector_store %arg8[%c0_10, %c0_11], %16 {strides = array<i32>} : memref<2x32xf32, #tpu.memory_space<vmem>>, vector<2x32xf32>,
    } else {
    }
    %c1_i32_6 = arith.constant 1 : i32
    %10 = arith.cmpi eq, %arg1, %c1_i32_6 : i32
    %11 = arith.extui %10 : i1 to i32
    %c0_i32_7 = arith.constant 0 : i32
    %12 = arith.cmpi ne, %11, %c0_i32_7 : i32
    scf.if %12 {
      %c0_8 = arith.constant 0 : index
      %c0_9 = arith.constant 0 : index
      %13 = vector.load %arg8[%c0_8, %c0_9] : memref<2x32xf32, #tpu.memory_space<vmem>>, vector<2x32xf32>
      %cst = arith.constant 0.0833333358 : f32
      %14 = vector.broadcast %cst : f32 to vector<2x32xf32>
      %15 = arith.mulf %13, %14 : vector<2x32xf32>
      %16 = arith.truncf %15 : vector<2x32xf32> to vector<2x32xbf16>
      %c0_10 = arith.constant 0 : index
      %c0_11 = arith.constant 0 : index
      %17 = vector.load %arg7[%c0_10, %c0_11] : memref<2x128xf32, #tpu.memory_space<vmem>>, vector<2x128xf32>
      %c0_12 = arith.constant 0 : index
      %c0_13 = arith.constant 0 : index
      %18 = vector.load %arg5[%c0_12, %c0_13] : memref<32x128xbf16, #tpu.memory_space<vmem>>, vector<32x128xbf16>
      %cst_14 = arith.constant dense<0.000000e+00> : vector<2x128xf32>
      %19 = tpu.matmul %16, %18, %cst_14 {dimension_numbers = #tpu.dot_dimension_numbers<[1], [0], [0], [1], [0, 0, 1, 1], [], []>} : vector<2x32xbf16>, vector<32x128xbf16>, vector<2x128xf32> -> vector<2x128xf32>
      %20 = arith.addf %17, %19 : vector<2x128xf32>
      %c0_15 = arith.constant 0 : index
      %c0_16 = arith.constant 0 : index
      %21 = vector.load %arg7[%c0_15, %c0_16] : memref<2x128xf32, #tpu.memory_space<vmem>>, vector<2x128xf32>
      tpu.vector_store %arg7[%c0_15, %c0_16], %20 {strides = array<i32>} : memref<2x128xf32, #tpu.memory_space<vmem>>, vector<2x128xf32>,
    } else {
    }
    return
  }
  func.func @transform_0(%arg0: i32, %arg1: i32) -> (i32, i32) {
    %c0_i32 = arith.constant 0 : i32
    %c0_i32_0 = arith.constant 0 : i32
    return %arg0, %c0_i32 : i32, i32
  }
  func.func @transform_1(%arg0: i32, %arg1: i32) -> (i32, i32, i32) {
    %c0_i32 = arith.constant 0 : i32
    %c0_i32_0 = arith.constant 0 : i32
    return %arg0, %arg1, %c0_i32 : i32, i32, i32
  }
  func.func @transform_2(%arg0: i32, %arg1: i32) -> (i32, i32) {
    %c0_i32 = arith.constant 0 : i32
    %c0_i32_0 = arith.constant 0 : i32
    %c0_i32_1 = arith.constant 0 : i32
    return %c0_i32, %c0_i32_0 : i32, i32
  }
  func.func @transform_3(%arg0: i32, %arg1: i32) -> (i32, i32) {
    %c0_i32 = arith.constant 0 : i32
    %c0_i32_0 = arith.constant 0 : i32
    %c0_i32_1 = arith.constant 0 : i32
    return %c0_i32, %c0_i32_0 : i32, i32
  }
  func.func @transform_4(%arg0: i32, %arg1: i32) -> (i32, i32) {
    %c0_i32 = arith.constant 0 : i32
    %c0_i32_0 = arith.constant 0 : i32
    %c0_i32_1 = arith.constant 0 : i32
    return %c0_i32, %c0_i32_0 : i32, i32
  }
  func.func @transform_5(%arg0: i32, %arg1: i32) -> (i32, i32) {
    %c0_i32 = arith.constant 0 : i32
    %c0_i32_0 = arith.constant 0 : i32
    return %arg0, %c0_i32 : i32, i32
  }
}

</mosaic_0001>

<bundles_post_ra>
// kernel: tpu_custom_call.1
= control target key start
LH: loop header
LB: loop body
LE: loop exit
PB: predicated region body
PF: predicated region fallthrough
CT: control target
= control target key end

     0   :  { %10 = vsyncpa [#allocation5], 0  ;;  %s801_s18 = smov 0   ;;  %s803_s19 = smov 0   ;;  %s914_s0 = inlined_call_operand.vmem [shape: f32[2,64], index: 0, kind: input, shape index: {}]   ;;  %s915_s1 = inlined_call_operand.vmem [shape: f32[2,12,32], index: 1, kind: input, shape index: {}]   ;;  %s916_s2 = inlined_call_operand.vmem [shape: bf16[64,128], index: 2, kind: input, shape index: {}]   ;;  %s917_s3 = inlined_call_operand.vmem [shape: bf16[32,128], index: 3, kind: input, shape index: {}]   ;;  %s918_s4 = inlined_call_operand.vmem [shape: f32[1,128], index: 4, kind: input, shape index: {}]   ;;  %s919_s5 = inlined_call_operand.hbm [shape: f32[2,128], index: 5, kind: output, shape index: {}]  }
   0x1   :  { %s805_s20 = smov 0   ;;  %s807_s21 = smov 0  }
   0x2   :  { %s809_s22 = smov 0  }
   0x3 LB: > { %s589_s23 = sadd.s32 4294967295, %s764_s22   ;;  %s25_s24 = sadd.s32 1, %s760_s21  ;;  %s764_s22 = sphi %s809_s22, %s16_s22   ;;  %s760_s21 = sphi %s807_s21, %s924_s21   ;;  %s756_s20 = sphi %s805_s20, %s923_s20   ;;  %s752_s19 = sphi %s803_s19, %s922_s19   ;;  %s748_s18 = sphi %s801_s18, %s921_s18  }
   0x4   : > { %p26_p0 = scmp.ge.s32.totalorder %s25_s24, 2  ;;  %p70_p1 = scmp.ne.s32.totalorder %s752_s19, %s748_s18 }
   0x5   : > { %p71_p2 = scmp.eq.s32.totalorder %s764_s22, 0  ;;  %s63_s26 = sadd.s32 1, %s752_s19 }
   0x6   : > { %s926_s24 = smov (%p26_p0, %s25_s24), 0  ;;  %p592_p5 = scmp.ge.s32.totalorder %s764_s22, 2 }
   0x7   : > { %p72_p3 = por %p71_p2, %p70_p1  ;;  %s59_s25 = ssub.s32 %s760_s21, %s926_s24 }
   0x8   : > { %p61_p4 = scmp.eq.s32.totalorder %s59_s25, 0  ;;  %201 = sbr.rel (%p592_p5) target bundleno = 18 (0x12), region = 32 }
   0xa   : > { %s837_s27 = scalar_select %p61_p4, %s752_s19, %s63_s26  }
   0xd   : > { %204 = sbr.rel (!%p72_p3) target bundleno = 18 (0x12), region = 36  ;;  %s206_s28 = sand.u32 (%p72_p3), 1, %s752_s19  }
   0xe   : > { %s594_s29 = sshll.u32 (%p72_p3), %s760_s21, 3  ;;  %s593_s30 = sshll.u32 (%p72_p3), %s206_s28, 4 }
   0xf   : > { %s213_s8 = scalar_lea.vmem (%p72_p3), %s915_s1, %s594_s29  ;;  %s208_s9 = scalar_lea.vmem (%p72_p3), [#allocation3], %s593_s30 }
  0x10   : > { %v244_v0 = vld [vmem:[%s213_s8] sm:$0xff] (%p72_p3)  ;;  %v246_v1 = vld [vmem:[%s213_s8 + $0x10] sm:$0xff] (%p72_p3) }
  0x11   : > { %245 = vst [vmem:[%s208_s9] sm:$0xff] (%p72_p3), %v244_v0  ;;  %247 = vst [vmem:[%s208_s9 + $0x8] sm:$0xff] (%p72_p3), %v246_v1 }
  0x12 PF: > { %p595_p6 = scmp.ge.s32.totalorder %s764_s22, 1  ;;  %p252_p7 = scmp.lt.s32.totalorder %s764_s22, 3 }
  0x14   : > { %p253_p8 = pnand %p595_p6, %p252_p7 }
  0x15   : > { %s259_s10 = sand.u32 (!%p253_p8), 1, %s748_s18   ;;  %p597_p9 = scmp.ne.s32.totalorder (!%p253_p8), %s756_s20, 0 }
  0x16   : > { %256 = sbr.rel (%p253_p8) target bundleno = 523 (0x20b), region = 74  ;;  %s848_s11 = sshll.u32 (!%p253_p8), %s259_s10, 4 }
  0x17   : > { %s261_s12 = scalar_lea.vmem (!%p253_p8), [#allocation3], %s848_s11 }
  0x1b   : > { %294 = sbr.rel (%p597_p9) target bundleno = 248 (0xf8), region = 82 }
  0x20   : > { %vm295_vm0 = vcmask 254976   ;;  %v766_v2 = vmov 0.0   ;;  %v692_v3 = vld [vmem:[%s916_s2 + $0x18] sm:$0xff]   ;;  %vm767_vm1 = vmmov 0   ;;  %v693_v4 = vld [vmem:[%s916_s2 + $0x10] sm:$0xff]   ;;  %v694_v5 = vld [vmem:[%s916_s2 + $0x8] sm:$0xff]  }
  0x21   : > { %296 = vst.msk [vmem:[#allocation2] sm:$0x3] %vm295_vm0, %v766_v2  ;;  %621 = vmatprep.subr.bf16.mxu0 %v766_v2  ;;  %629 = vmatprep.mubr.msk.bf16.mxu0 %vm767_vm1, %v766_v2  ;;  %v695_v6 = vld [vmem:[%s916_s2] sm:$0xff]   ;;  %vm338_vm2 = vcmask 523264  }
  0x22   : > { %622 = vmatpush3.bf16.msra.mxu0 %v692_v3  ;;  %v297_v7 = vld [vmem:[%s914_s0] sm:$0x3] }
  0x23   : > { %623 = vmatprep.subr.bf16.mxu0 %v766_v2  ;;  %v298_v8 = vpack.c.bf16 %v297_v7, %v297_v7  ;;  %v598_v9 = vld [vmem:[%s918_s4] ss:$0 sm:$0xff] }
  0x26   : > { %624 = vmatpush3.bf16.msra.mxu0 %v693_v4 }
  0x27   : > { %625 = vmatprep.subr.bf16.mxu0 %v766_v2 }
  0x2a   : > { %626 = vmatpush3.bf16.msra.mxu0 %v694_v5 }
  0x2b   : > { %627 = vmatprep.subr.bf16.mxu0 %v766_v2 }
  0x2e   : > { %628 = vmatpush3.bf16.msra.mxu0 %v695_v6 }
  0x31   : > { %630 = vmatmul.mubr.msk.bf16.vlgmr.msra.gmra.mxu0 %vm338_vm2, %v298_v8 }
  0xf1   : > { %v376_v10 = vpop.f32.mrf.mxu0 }
  0xf2   : > { %v377_v11 = vadd.f32 %v598_v9, %v376_v10 }
  0xf3   : > { %v631_v12 = vpop.f32.mrf.mxu0 }
  0xf4   : > { %382 = vst [vmem:[#allocation4] sm:$0x3] %v377_v11 }
  0xf5   : > { %v379_v13 = vpop.f32.mrf.mxu0 }
  0xf7   : > { %v632_v14 = vpop.f32.mrf.mxu0 }
  0xf8 PF: > { %v383_v15 = vld [vmem:[%s261_s12] sm:$0xff]  ;;  %v384_v16 = vld [vmem:[%s261_s12 + $0x8] sm:$0xff]  ;;  %p604_p10 = scmp.ge.s32.totalorder %s756_s20, 1 }
  0xfa   : > { %388 = sbr.rel (%p604_p10) target bundleno = 273 (0x111), region = 86 }
  0xff   : > { %vm390_vm3 = vcmask 261120   ;;  %vm407_vm4 = vcmask 1041409   ;;  %v389_v29 = vld [vmem:[#allocation2] sm:$0x3]  ;;  %vm411_vm5 = vcmask 254976  }
 0x100   : > { %v391_v17 = vsel %vm390_vm3, %v383_v15, 0.0  ;;  %v398_v18 = vsel %vm390_vm3, %v384_v16, 0.0 }
 0x101   : > { %v392_v19 = vrot.slane %v391_v17, 4  ;;  %v399_v20 = vrot.slane %v398_v18, 4 }
 0x103   : > { %v393_v21 = vadd.f32 %v392_v19, %v391_v17  ;;  %v400_v22 = vadd.f32 %v399_v20, %v398_v18 }
 0x105   : > { %v394_v23 = vrot.slane %v393_v21, 2  ;;  %v401_v24 = vrot.slane %v400_v22, 2 }
 0x107   : > { %v395_v25 = vadd.f32 %v394_v23, %v393_v21  ;;  %v402_v26 = vadd.f32 %v401_v24, %v400_v22 }
 0x109   : > { %v396_v27 = vrot.slane %v395_v25, 1  ;;  %v403_v28 = vrot.slane %v402_v26, 1 }
 0x10b   : > { %v397_v30 = vadd.f32 %v396_v27, %v395_v25  ;;  %v404_v31 = vadd.f32 %v403_v28, %v402_v26 }
 0x10d   : > { %v408_v32 = vsel %vm407_vm4, %v404_v31, %v397_v30 }
 0x10e   : > { %v410_v33 = vadd.f32 %v408_v32, %v389_v29 }
 0x110   : > { %412 = vst.msk [vmem:[#allocation2] sm:$0x3] %vm411_vm5, %v410_v33 }
 0x111 PF: > { %p605_p11 = scmp.ne.s32.totalorder %s756_s20, 1 }
 0x113   : > { %416 = sbr.rel (%p605_p11) target bundleno = 508 (0x1fc), region = 90 }
 0x118   : > { %v696_v34 = vld [vmem:[%s917_s3 + $0x8] sm:$0xff]   ;;  %v768_v35 = vmov 0.0   ;;  %v697_v36 = vld [vmem:[%s917_s3] sm:$0xff]   ;;  %vm769_vm6 = vmmov 0   ;;  %vm418_vm7 = vcmask 257024   ;;  %vm435_vm8 = vcmask 1041409  }
 0x119   : > { %633 = vmatprep.subr.bf16.mxu0 %v768_v35  ;;  %637 = vmatprep.mubr.msk.bf16.mxu0 %vm769_vm6, %v768_v35  ;;  %v419_v37 = vsel %vm418_vm7, %v383_v15, 0.0  ;;  %v426_v38 = vsel %vm418_vm7, %v384_v16, 0.0  ;;  %v417_v49 = vld [vmem:[#allocation2] sm:$0x3]  ;;  %vm439_vm9 = vcmask 254976   ;;  %vm461_vm10 = vcmask 261120  }
 0x11a   : > { %634 = vmatpush3.bf16.msra.mxu0 %v696_v34  ;;  %v420_v39 = vrot.slane %v419_v37, 4  ;;  %v427_v40 = vrot.slane %v426_v38, 4  ;;  %v444_v57 = vld [vmem:[#allocation4] sm:$0x3] }
 0x11b   : > { %635 = vmatprep.subr.bf16.mxu0 %v768_v35 }
 0x11c   : > { %v421_v41 = vadd.f32 %v420_v39, %v419_v37  ;;  %v428_v42 = vadd.f32 %v427_v40, %v426_v38 }
 0x11e   : > { %636 = vmatpush3.bf16.msra.mxu0 %v697_v36  ;;  %v422_v43 = vrot.slane %v421_v41, 2  ;;  %v429_v44 = vrot.slane %v428_v42, 2 }
 0x120   : > { %v423_v45 = vadd.f32 %v422_v43, %v421_v41  ;;  %v430_v46 = vadd.f32 %v429_v44, %v428_v42 }
 0x122   : > { %v424_v47 = vrot.slane %v423_v45, 1  ;;  %v431_v48 = vrot.slane %v430_v46, 1 }
 0x124   : > { %v425_v50 = vadd.f32 %v424_v47, %v423_v45  ;;  %v432_v51 = vadd.f32 %v431_v48, %v430_v46 }
 0x126   : > { %v436_v52 = vsel %vm435_vm8, %v432_v51, %v425_v50 }
 0x127   : > { %v438_v53 = vadd.f32 %v436_v52, %v417_v49 }
 0x129   : > { %440 = vst.msk [vmem:[#allocation2] sm:$0x3] %vm439_vm9, %v438_v53 }
 0x130   : > { %v441_v54 = vld [vmem:[#allocation2] sm:$0x3] }
 0x131   : > { %v442_v55 = vmul.f32 0.083333336, %v441_v54 }
 0x133   : > { %v443_v56 = vpack.c.bf16 %v442_v55, %v442_v55 }
 0x135   : > { %638 = vmatmul.mubr.msk.bf16.vlgmr.msra.gmra.mxu0 %vm461_vm10, %v443_v56 }
 0x1f5   : > { %v499_v58 = vpop.f32.mrf.mxu0 }
 0x1f6   : > { %v505_v59 = vadd.f32 %v499_v58, %v444_v57 }
 0x1f7   : > { %v639_v60 = vpop.f32.mrf.mxu0 }
 0x1f8   : > { %506 = vst [vmem:[#allocation4] sm:$0x3] %v505_v59 }
 0x1f9   : > { %v502_v61 = vpop.f32.mrf.mxu0 }
 0x1fb   : > { %v640_v62 = vpop.f32.mrf.mxu0 }
 0x1fc PF: > { %p884_p12 = scmp.eq.s32.totalorder %s589_s23, 1  ;;  %s770_s11 = smov [#allocation4]  }
 0x1fd   : > { %s516_s12 = sshll.u32 %s770_s11, 4  ;;  %s517_s12 = int_to_ptr.vmem [resolvable:$true] %s516_s12 }
 0x1fe   : > { %s698_s13 = scalar_lea.vmem %s517_s12, 32  ;;  %p705_p2 = scmp.lt.s32.totalorder %s517_s12, %s517_s12 }
 0x1ff   : > { %p699_p13 = scmp.ne.s32.totalorder %s517_s12, %s698_s13  ;;  %p706_p3 = scmp.lt.s32.totalorder %s698_s13, %s698_s13 }
 0x201   : > { %p700_p0 = pnand %p699_p13, %p884_p12  ;;  %p707_p4 = por %p706_p3, %p705_p2 }
 0x203   : > { %p701_p1 = pneg %p700_p0 }
 0x205   : > { %p708_p5 = pnand %p707_p4, %p701_p1 }
 0x207   : > { %711 = shalt.err (!%p708_p5)
}
 0x208   : > { %642 = dma.vmem_to_hbm [thread:$0]  (%p884_p12), %s517_s12, 32, %s919_s5, [#allocation5]  }
 0x209   : > { %743 = dma.done.wait (%p884_p12), [#allocation5], 32  }
 0x20a   : > { %745 = vsyncadd (%p884_p12), [#allocation5], 4294967264 }
 0x20b PF: > { %s16_s22 = sadd.s32 1, %s764_s22   ;;  %s921_s18 = smov %s752_s19 }
 0x20c   : > { %p13_p6 = scmp.ge.s32.totalorder %s16_s22, 4   ;;  %s922_s19 = smov %s837_s27 }
 0x20d   : > { %s923_s20 = smov %s760_s21  ;;  %s924_s21 = smov %s926_s24 }
 0x20e   :  { %15 = sbr.rel (!%p13_p6) target bundleno = 3 (0x3), region = 126 }
 0x213   :  { %529 = vsyncpa [#allocation5], 1 }
 0x214   :  { %531 = vsyncpa [#allocation5 + $0x1], 1 }

</bundles_post_ra>
